<compile_context>
chip_gen: v7x
topology: tpu7x:2x2x1
jax: 0.10.0
libtpu: 0.0.40
codegen_flags: <defaults>
</compile_context>

<pallas_src>
import functools

import jax
import jax.numpy as jnp
from jax.experimental import pallas as pl
from jax.experimental.pallas import tpu as pltpu


def _round_up(x, m):
    return (x + m - 1) // m * m


def _leaky_relu(x, slope=0.3):
    return jnp.where(x > 0, x, slope * x)


def deep_ff_kernel(x_ref, w1_ref, b1_ref, w2_ref, b2_ref, w3_ref, b3_ref, o_ref):
    x = x_ref[...]                                         # (bm, D_in_p) bf16
    cd = x.dtype                                           # MXU input dtype

    # Linear 1: D -> 2D   (f32 accumulate, bias-add in f32)
    h = jnp.dot(x, w1_ref[...], preferred_element_type=jnp.float32) + b1_ref[...]
    # Linear 2: 2D -> 2D
    h = jnp.dot(h.astype(cd), w2_ref[...],
                preferred_element_type=jnp.float32) + b2_ref[...]
    h = _leaky_relu(h)                                     # LeakyReLU in f32
    # Linear 3: 2D -> D_out
    h = jnp.dot(h.astype(cd), w3_ref[...],
                preferred_element_type=jnp.float32) + b3_ref[...]
    o_ref[...] = _leaky_relu(h).astype(o_ref.dtype)


@functools.partial(jax.jit, static_argnames=("block_m", "compute_dtype"))
def deep_feed_forward(x, params, *, block_m=256, compute_dtype=jnp.bfloat16):
    """x: (B, D_in) float32. params: dict of w1,b1,w2,b2,w3,b3 (float32)."""
    B, D_in = x.shape
    H = params["w1"].shape[1]          # 2 * D_in
    D_out = params["w3"].shape[1]
    out_dtype = x.dtype

    # Lane-dense padding: every feature dim becomes a multiple of 128.
    D_in_p = _round_up(D_in, 128)
    H_p = _round_up(H, 128)
    D_out_p = _round_up(D_out, 128)

    # Row tile: multiple of 128 (MXU rows, bf16 sublane-safe); shrink for tiny B,
    # and for real batches keep the grid >= 2 so both TensorCores get work.
    bm = max(128, min(block_m, _round_up(B, 128)))
    if B > bm and _round_up(B, bm) // bm < 2:
        bm = max(128, bm // 2)
    B_p = _round_up(B, bm)
    grid = (B_p // bm,)

    # Zero-pad inputs / weights / biases (padded rows/cols contribute exact 0s).
    xp = jnp.pad(x, ((0, B_p - B), (0, D_in_p - D_in))).astype(compute_dtype)
    w1 = jnp.pad(params["w1"], ((0, D_in_p - D_in), (0, H_p - H))).astype(compute_dtype)
    w2 = jnp.pad(params["w2"], ((0, H_p - H), (0, H_p - H))).astype(compute_dtype)
    w3 = jnp.pad(params["w3"], ((0, H_p - H), (0, D_out_p - D_out))).astype(compute_dtype)
    b1 = jnp.pad(params["b1"], ((0, 0), (0, H_p - H))).astype(jnp.float32)
    b2 = jnp.pad(params["b2"], ((0, 0), (0, H_p - H))).astype(jnp.float32)
    b3 = jnp.pad(params["b3"], ((0, 0), (0, D_out_p - D_out))).astype(jnp.float32)

    # VMEM budget: resident weights + biases + double-buffered x/out tiles.
    itemsize = jnp.dtype(compute_dtype).itemsize
    w_bytes = (D_in_p * H_p + H_p * H_p + H_p * D_out_p) * itemsize
    b_bytes = (2 * H_p + D_out_p) * 4
    tile_bytes = bm * D_in_p * itemsize + bm * D_out_p * 4
    vmem_need = 2 * (w_bytes + b_bytes + tile_bytes)        # pipeline double-buffers
    vmem_limit = int(min(max(vmem_need + (8 << 20), 32 << 20), 64 << 20))

    flops = 2 * B_p * (D_in_p * H_p + H_p * H_p + H_p * D_out_p)
    bytes_accessed = (xp.size * itemsize + w_bytes + b_bytes
                      + B_p * D_out_p * jnp.dtype(out_dtype).itemsize)

    out_p = pl.pallas_call(
        deep_ff_kernel,
        out_shape=jax.ShapeDtypeStruct((B_p, D_out_p), out_dtype),
        grid_spec=pltpu.PrefetchScalarGridSpec(
            num_scalar_prefetch=0,
            grid=grid,
            in_specs=[
                pl.BlockSpec((bm, D_in_p), lambda i: (i, 0)),     # x row tile
                pl.BlockSpec((D_in_p, H_p), lambda i: (0, 0)),    # w1 (resident)
                pl.BlockSpec((1, H_p), lambda i: (0, 0)),         # b1
                pl.BlockSpec((H_p, H_p), lambda i: (0, 0)),       # w2 (resident)
                pl.BlockSpec((1, H_p), lambda i: (0, 0)),         # b2
                pl.BlockSpec((H_p, D_out_p), lambda i: (0, 0)),   # w3 (resident)
                pl.BlockSpec((1, D_out_p), lambda i: (0, 0)),     # b3
            ],
            out_specs=pl.BlockSpec((bm, D_out_p), lambda i: (i, 0)),
        ),
        compiler_params=pltpu.CompilerParams(
            dimension_semantics=("parallel",),
            vmem_limit_bytes=vmem_limit,
        ),
        cost_estimate=pl.CostEstimate(
            flops=int(flops), transcendentals=0, bytes_accessed=int(bytes_accessed)),
    )(xp, w1, b1, w2, b2, w3, b3)

    return out_p[:B, :D_out]


def init_params(key, input_dim, output_dim, dtype=jnp.float32):
    """Deterministic PyTorch-style (uniform +/- 1/sqrt(fan_in)) init for the 3 Linears."""
    hidden = input_dim * 2
    dims = [(input_dim, hidden), (hidden, hidden), (hidden, output_dim)]
    params = {}
    for idx, (fan_in, fan_out) in enumerate(dims, start=1):
        key, kw, kb = jax.random.split(key, 3)
        bound = 1.0 / jnp.sqrt(fan_in)
        params[f"w{idx}"] = jax.random.uniform(
            kw, (fan_in, fan_out), dtype, minval=-bound, maxval=bound)
        params[f"b{idx}"] = jax.random.uniform(
            kb, (1, fan_out), dtype, minval=-bound, maxval=bound)
    return params


def reference_forward_f32(x, params):
    """Plain-JAX f32 reference matching the PyTorch module semantics."""
    h = x @ params["w1"] + params["b1"]
    h = h @ params["w2"] + params["b2"]
    h = jnp.where(h > 0, h, 0.3 * h)
    h = h @ params["w3"] + params["b3"]
    return jnp.where(h > 0, h, 0.3 * h)


def reference_forward_bf16(x, params):
    """Plain-JAX reference mirroring the kernel's bf16-input / f32-accumulate math."""
    cd = jnp.bfloat16
    h = jnp.dot(x.astype(cd), params["w1"].astype(cd),
                preferred_element_type=jnp.float32) + params["b1"]
    h = jnp.dot(h.astype(cd), params["w2"].astype(cd),
                preferred_element_type=jnp.float32) + params["b2"]
    h = jnp.where(h > 0, h, 0.3 * h)
    h = jnp.dot(h.astype(cd), params["w3"].astype(cd),
                preferred_element_type=jnp.float32) + params["b3"]
    return jnp.where(h > 0, h, 0.3 * h)


if __name__ == "__main__":
    B, D_IN, D_OUT = 8, 32, 16

    key = jax.random.PRNGKey(0)
    key, kx = jax.random.split(key)
    x = jax.random.normal(kx, (B, D_IN), jnp.float32)
    params = init_params(key, D_IN, D_OUT)

    out = deep_feed_forward(x, params)
    out = jax.block_until_ready(out)
    assert out.shape == (B, D_OUT), out.shape

    # Tight check against a bf16-matched reference (same quantization as kernel).
    ref_bf16 = reference_forward_bf16(x, params)
    err_bf16 = float(jnp.max(jnp.abs(out - ref_bf16)))
    assert jnp.allclose(out, ref_bf16, atol=1e-3, rtol=1e-3), err_bf16

    # Looser sanity check against the pure-f32 PyTorch-equivalent reference.
    ref_f32 = reference_forward_f32(x, params)
    err_f32 = float(jnp.max(jnp.abs(out - ref_f32)))
    assert jnp.allclose(out, ref_f32, atol=1e-1, rtol=1e-1), err_f32

    print("KERNEL_OK")
</pallas_src>

<mosaic_0001>
module attributes {stable_mosaic.version = 11 : i64} {
  func.func @deep_ff_kernel(%arg0: i32, %arg1: memref<128x128xbf16, #tpu.memory_space<vmem>>, %arg2: memref<128x128xbf16, #tpu.memory_space<vmem>>, %arg3: memref<1x128xf32, #tpu.memory_space<vmem>>, %arg4: memref<128x128xbf16, #tpu.memory_space<vmem>>, %arg5: memref<1x128xf32, #tpu.memory_space<vmem>>, %arg6: memref<128x128xbf16, #tpu.memory_space<vmem>>, %arg7: memref<1x128xf32, #tpu.memory_space<vmem>>, %arg8: memref<128x128xf32, #tpu.memory_space<vmem>>) attributes {dimension_semantics = [#tpu.dimension_semantics<parallel>], iteration_bounds = array<i64: 1>, scalar_prefetch = 0 : i64, scratch_operands = 0 : i64, tpu.core_type = #tpu.core_type<tc>, window_params = [{transform_indices = @transform_0, window_bounds = array<i64: 128, 128>}, {pipeline_mode = #tpu.pipeline_mode<synchronous>, transform_indices = @transform_1, window_bounds = array<i64: 128, 128>}, {pipeline_mode = #tpu.pipeline_mode<synchronous>, transform_indices = @transform_2, window_bounds = array<i64: 1, 128>}, {pipeline_mode = #tpu.pipeline_mode<synchronous>, transform_indices = @transform_3, window_bounds = array<i64: 128, 128>}, {pipeline_mode = #tpu.pipeline_mode<synchronous>, transform_indices = @transform_4, window_bounds = array<i64: 1, 128>}, {pipeline_mode = #tpu.pipeline_mode<synchronous>, transform_indices = @transform_5, window_bounds = array<i64: 128, 128>}, {pipeline_mode = #tpu.pipeline_mode<synchronous>, transform_indices = @transform_6, window_bounds = array<i64: 1, 128>}, {transform_indices = @transform_7, window_bounds = array<i64: 128, 128>}]} {
    %c0 = arith.constant 0 : index
    %c0_0 = arith.constant 0 : index
    %0 = vector.load %arg1[%c0, %c0_0] : memref<128x128xbf16, #tpu.memory_space<vmem>>, vector<128x128xbf16>
    %c0_1 = arith.constant 0 : index
    %c0_2 = arith.constant 0 : index
    %1 = vector.load %arg2[%c0_1, %c0_2] : memref<128x128xbf16, #tpu.memory_space<vmem>>, vector<128x128xbf16>
    %cst = arith.constant dense<0.000000e+00> : vector<128x128xf32>
    %2 = tpu.matmul %0, %1, %cst {dimension_numbers = #tpu.dot_dimension_numbers<[1], [0], [0], [1], [0, 0, 1, 1], [], []>} : vector<128x128xbf16>, vector<128x128xbf16>, vector<128x128xf32> -> vector<128x128xf32>
    %c0_3 = arith.constant 0 : index
    %c0_4 = arith.constant 0 : index
    %3 = vector.load %arg3[%c0_3, %c0_4] : memref<1x128xf32, #tpu.memory_space<vmem>>, vector<1x128xf32>
    %4 = vector.broadcast %3 : vector<1x128xf32> to vector<128x128xf32>
    %5 = arith.addf %2, %4 : vector<128x128xf32>
    %6 = arith.truncf %5 : vector<128x128xf32> to vector<128x128xbf16>
    %c0_5 = arith.constant 0 : index
    %c0_6 = arith.constant 0 : index
    %7 = vector.load %arg4[%c0_5, %c0_6] : memref<128x128xbf16, #tpu.memory_space<vmem>>, vector<128x128xbf16>
    %cst_7 = arith.constant dense<0.000000e+00> : vector<128x128xf32>
    %8 = tpu.matmul %6, %7, %cst_7 {dimension_numbers = #tpu.dot_dimension_numbers<[1], [0], [0], [1], [0, 0, 1, 1], [], []>} : vector<128x128xbf16>, vector<128x128xbf16>, vector<128x128xf32> -> vector<128x128xf32>
    %c0_8 = arith.constant 0 : index
    %c0_9 = arith.constant 0 : index
    %9 = vector.load %arg5[%c0_8, %c0_9] : memref<1x128xf32, #tpu.memory_space<vmem>>, vector<1x128xf32>
    %10 = vector.broadcast %9 : vector<1x128xf32> to vector<128x128xf32>
    %11 = arith.addf %8, %10 : vector<128x128xf32>
    %cst_10 = arith.constant 0.000000e+00 : f32
    %12 = vector.broadcast %cst_10 : f32 to vector<128x128xf32>
    %13 = arith.cmpf ogt, %11, %12 : vector<128x128xf32>
    %cst_11 = arith.constant 3.000000e-01 : f32
    %14 = vector.broadcast %cst_11 : f32 to vector<128x128xf32>
    %15 = arith.mulf %14, %11 : vector<128x128xf32>
    %16 = arith.select %13, %11, %15 : vector<128x128xi1>, vector<128x128xf32>
    %17 = arith.truncf %16 : vector<128x128xf32> to vector<128x128xbf16>
    %c0_12 = arith.constant 0 : index
    %c0_13 = arith.constant 0 : index
    %18 = vector.load %arg6[%c0_12, %c0_13] : memref<128x128xbf16, #tpu.memory_space<vmem>>, vector<128x128xbf16>
    %cst_14 = arith.constant dense<0.000000e+00> : vector<128x128xf32>
    %19 = tpu.matmul %17, %18, %cst_14 {dimension_numbers = #tpu.dot_dimension_numbers<[1], [0], [0], [1], [0, 0, 1, 1], [], []>} : vector<128x128xbf16>, vector<128x128xbf16>, vector<128x128xf32> -> vector<128x128xf32>
    %c0_15 = arith.constant 0 : index
    %c0_16 = arith.constant 0 : index
    %20 = vector.load %arg7[%c0_15, %c0_16] : memref<1x128xf32, #tpu.memory_space<vmem>>, vector<1x128xf32>
    %21 = vector.broadcast %20 : vector<1x128xf32> to vector<128x128xf32>
    %22 = arith.addf %19, %21 : vector<128x128xf32>
    %cst_17 = arith.constant 0.000000e+00 : f32
    %23 = vector.broadcast %cst_17 : f32 to vector<128x128xf32>
    %24 = arith.cmpf ogt, %22, %23 : vector<128x128xf32>
    %cst_18 = arith.constant 3.000000e-01 : f32
    %25 = vector.broadcast %cst_18 : f32 to vector<128x128xf32>
    %26 = arith.mulf %25, %22 : vector<128x128xf32>
    %27 = arith.select %24, %22, %26 : vector<128x128xi1>, vector<128x128xf32>
    %c0_19 = arith.constant 0 : index
    %c0_20 = arith.constant 0 : index
    %28 = vector.load %arg8[%c0_19, %c0_20] : memref<128x128xf32, #tpu.memory_space<vmem>>, vector<128x128xf32>
    tpu.vector_store %arg8[%c0_19, %c0_20], %27 {strides = array<i32>} : memref<128x128xf32, #tpu.memory_space<vmem>>, vector<128x128xf32>,
    return
  }
  func.func @transform_0(%arg0: i32) -> (i32, i32) {
    %c0_i32 = arith.constant 0 : i32
    %c0_i32_0 = arith.constant 0 : i32
    return %arg0, %c0_i32 : i32, i32
  }
  func.func @transform_1(%arg0: i32) -> (i32, i32) {
    %c0_i32 = arith.constant 0 : i32
    %c0_i32_0 = arith.constant 0 : i32
    %c0_i32_1 = arith.constant 0 : i32
    return %c0_i32, %c0_i32_0 : i32, i32
  }
  func.func @transform_2(%arg0: i32) -> (i32, i32) {
    %c0_i32 = arith.constant 0 : i32
    %c0_i32_0 = arith.constant 0 : i32
    %c0_i32_1 = arith.constant 0 : i32
    return %c0_i32, %c0_i32_0 : i32, i32
  }
  func.func @transform_3(%arg0: i32) -> (i32, i32) {
    %c0_i32 = arith.constant 0 : i32
    %c0_i32_0 = arith.constant 0 : i32
    %c0_i32_1 = arith.constant 0 : i32
    return %c0_i32, %c0_i32_0 : i32, i32
  }
  func.func @transform_4(%arg0: i32) -> (i32, i32) {
    %c0_i32 = arith.constant 0 : i32
    %c0_i32_0 = arith.constant 0 : i32
    %c0_i32_1 = arith.constant 0 : i32
    return %c0_i32, %c0_i32_0 : i32, i32
  }
  func.func @transform_5(%arg0: i32) -> (i32, i32) {
    %c0_i32 = arith.constant 0 : i32
    %c0_i32_0 = arith.constant 0 : i32
    %c0_i32_1 = arith.constant 0 : i32
    return %c0_i32, %c0_i32_0 : i32, i32
  }
  func.func @transform_6(%arg0: i32) -> (i32, i32) {
    %c0_i32 = arith.constant 0 : i32
    %c0_i32_0 = arith.constant 0 : i32
    %c0_i32_1 = arith.constant 0 : i32
    return %c0_i32, %c0_i32_0 : i32, i32
  }
  func.func @transform_7(%arg0: i32) -> (i32, i32) {
    %c0_i32 = arith.constant 0 : i32
    %c0_i32_0 = arith.constant 0 : i32
    return %arg0, %c0_i32 : i32, i32
  }
}

</mosaic_0001>

<bundles_post_ra>
// kernel: deep_feed_forward.1
= control target key start
LH: loop header
LB: loop body
LE: loop exit
PB: predicated region body
PF: predicated region fallthrough
CT: control target
= control target key end

     0   :  { %s1183_s1 = inlined_call_operand.vmem [shape: bf16[128,128], index: 1, kind: input, shape index: {}]   ;;  %s1184_s0 = inlined_call_operand.vmem [shape: bf16[128,128], index: 0, kind: input, shape index: {}]   ;;  %s1185_s3 = inlined_call_operand.vmem [shape: bf16[128,128], index: 3, kind: input, shape index: {}]   ;;  %s1186_s5 = inlined_call_operand.vmem [shape: bf16[128,128], index: 5, kind: input, shape index: {}]   ;;  %s1187_s2 = inlined_call_operand.vmem [shape: f32[1,128], index: 2, kind: input, shape index: {}]   ;;  %s1188_s4 = inlined_call_operand.vmem [shape: f32[1,128], index: 4, kind: input, shape index: {}]   ;;  %s1189_s6 = inlined_call_operand.vmem [shape: f32[1,128], index: 6, kind: input, shape index: {}]   ;;  %s1190_s7 = inlined_call_operand.vmem [shape: f32[128,128], index: 7, kind: output, shape index: {}]  }
   0x1   :  { %v922_v0 = vld [vmem:[%s1183_s1] sm:$0xff]   ;;  %v923_v1 = vld [vmem:[%s1183_s1 + $0x8] sm:$0xff]   ;;  %v924_v2 = vld [vmem:[%s1183_s1 + $0x10] sm:$0xff]  }
   0x2   :  { %810 = vmatprep.subr.bf16.mxu0 %v922_v0  ;;  %v925_v3 = vld [vmem:[%s1183_s1 + $0x18] sm:$0xff]   ;;  %v930_v4 = vld [vmem:[%s1184_s0] sm:$0xff]   ;;  %v927_v6 = vld [vmem:[%s1183_s1 + $0x28] sm:$0xff]  }
   0x3   :  { %811 = vmatpush3.bf16.msra.mxu0 %v922_v0  ;;  %826 = vmatprep.mubr.bf16.mxu0 %v930_v4  ;;  %v926_v5 = vld [vmem:[%s1183_s1 + $0x20] sm:$0xff]   ;;  %v939_v8 = vld [vmem:[%s1185_s3 + $0x8] sm:$0xff]   ;;  %v928_v9 = vld [vmem:[%s1183_s1 + $0x30] sm:$0xff]  }
   0x4   :  { %812 = vmatprep.subr.bf16.mxu0 %v923_v1  ;;  %v938_v7 = vld [vmem:[%s1185_s3] sm:$0xff]   ;;  %v940_v10 = vld [vmem:[%s1185_s3 + $0x10] sm:$0xff]   ;;  %v929_v11 = vld [vmem:[%s1183_s1 + $0x38] sm:$0xff]  }
   0x5   :  { %842 = vmatprep.subr.bf16.mxu1 %v938_v7  ;;  %v941_v12 = vld [vmem:[%s1185_s3 + $0x18] sm:$0xff]   ;;  %v942_v13 = vld [vmem:[%s1185_s3 + $0x20] sm:$0xff]   ;;  %v931_v14 = vld [vmem:[%s1184_s0 + $0x8] sm:$0xff]  }
   0x6   :  { %843 = vmatpush3.bf16.msra.mxu1 %v938_v7  ;;  %v932_v15 = vld [vmem:[%s1184_s0 + $0x10] sm:$0xff]   ;;  %v943_v16 = vld [vmem:[%s1185_s3 + $0x28] sm:$0xff]   ;;  %v933_v17 = vld [vmem:[%s1184_s0 + $0x18] sm:$0xff]  }
   0x7   :  { %813 = vmatpush3.bf16.msra.mxu0 %v923_v1  ;;  %844 = vmatprep.subr.bf16.mxu1 %v939_v8  ;;  %v934_v18 = vld [vmem:[%s1184_s0 + $0x20] sm:$0xff]   ;;  %v935_v19 = vld [vmem:[%s1184_s0 + $0x28] sm:$0xff]   ;;  %v936_v20 = vld [vmem:[%s1184_s0 + $0x30] sm:$0xff]  }
   0x8   :  { %814 = vmatprep.subr.bf16.mxu0 %v924_v2  ;;  %v937_v21 = vld [vmem:[%s1184_s0 + $0x38] sm:$0xff]   ;;  %v944_v22 = vld [vmem:[%s1185_s3 + $0x30] sm:$0xff]   ;;  %v946_v24 = vld [vmem:[%s1186_s5] sm:$0xff]  }
   0x9   :  { %v945_v23 = vld [vmem:[%s1185_s3 + $0x38] sm:$0xff]   ;;  %v947_v25 = vld [vmem:[%s1186_s5 + $0x8] sm:$0xff]   ;;  %v948_v26 = vld [vmem:[%s1186_s5 + $0x10] sm:$0xff]  }
   0xa   :  { %845 = vmatpush3.bf16.msra.mxu1 %v939_v8  ;;  %v949_v27 = vld [vmem:[%s1186_s5 + $0x18] sm:$0xff]   ;;  %v950_v28 = vld [vmem:[%s1186_s5 + $0x20] sm:$0xff]   ;;  %v952_v7 = vld [vmem:[%s1186_s5 + $0x30] sm:$0xff]  }
   0xb   :  { %815 = vmatpush3.bf16.msra.mxu0 %v924_v2  ;;  %846 = vmatprep.subr.bf16.mxu1 %v940_v10  ;;  %v727_v30 = vld [vmem:[%s1187_s2] ss:$0 sm:$0xff]  ;;  %v953_v8 = vld [vmem:[%s1186_s5 + $0x38] sm:$0xff]  }
   0xc   :  { %816 = vmatprep.subr.bf16.mxu0 %v925_v3 }
   0xe   :  { %847 = vmatpush3.bf16.msra.mxu1 %v940_v10 }
   0xf   :  { %817 = vmatpush3.bf16.msra.mxu0 %v925_v3  ;;  %848 = vmatprep.subr.bf16.mxu1 %v941_v12 }
  0x10   :  { %818 = vmatprep.subr.bf16.mxu0 %v926_v5 }
  0x12   :  { %849 = vmatpush3.bf16.msra.mxu1 %v941_v12 }
  0x13   :  { %819 = vmatpush3.bf16.msra.mxu0 %v926_v5  ;;  %850 = vmatprep.subr.bf16.mxu1 %v942_v13 }
  0x14   :  { %820 = vmatprep.subr.bf16.mxu0 %v927_v6 }
  0x16   :  { %851 = vmatpush3.bf16.msra.mxu1 %v942_v13 }
  0x17   :  { %821 = vmatpush3.bf16.msra.mxu0 %v927_v6  ;;  %852 = vmatprep.subr.bf16.mxu1 %v943_v16  ;;  %v951_v6 = vld [vmem:[%s1186_s5 + $0x28] sm:$0xff]  }
  0x18   :  { %822 = vmatprep.subr.bf16.mxu0 %v928_v9 }
  0x1a   :  { %853 = vmatpush3.bf16.msra.mxu1 %v943_v16 }
  0x1b   :  { %823 = vmatpush3.bf16.msra.mxu0 %v928_v9  ;;  %854 = vmatprep.subr.bf16.mxu1 %v944_v22  ;;  %v1096_v9 = vld [vmem:[%s1188_s4] ss:$0 sm:$0xff] }
  0x1c   :  { %824 = vmatprep.subr.bf16.mxu0 %v929_v11 }
  0x1e   :  { %855 = vmatpush3.bf16.msra.mxu1 %v944_v22 }
  0x1f   :  { %825 = vmatpush3.bf16.msra.mxu0 %v929_v11  ;;  %856 = vmatprep.subr.bf16.mxu1 %v945_v23 }
  0x20   :  { %874 = vmatprep.subr.bf16.mxu0 %v946_v24 }
  0x22   :  { %827 = vmatmul.mubr.bf16.vlgmr.msra.gmra.mrb[0].mxu0 %v931_v14  ;;  %857 = vmatpush3.bf16.msra.mxu1 %v945_v23 }
  0x23   :  { %830 = vmatprep.mubr.bf16.mxu0 %v932_v15  ;;  %906 = vmatprep.subr.bf16.mxu1 %v946_v24 }
  0x24   :  { %875 = vmatpush3.bf16.msra.mxu0 %v946_v24 }
  0x25   :  { %876 = vmatprep.subr.bf16.mxu0 %v947_v25 }
  0x28   :  { %877 = vmatpush3.bf16.msra.mxu0 %v947_v25 }
  0x29   :  { %878 = vmatprep.subr.bf16.mxu0 %v948_v26 }
  0x2a   :  { %831 = vmatmul.mubr.bf16.gmra.mrb[4].mxu0 %v933_v17 }
  0x2b   :  { %834 = vmatprep.mubr.bf16.mxu0 %v934_v18 }
  0x2c   :  { %879 = vmatpush3.bf16.msra.mxu0 %v948_v26 }
  0x2d   :  { %880 = vmatprep.subr.bf16.mxu0 %v949_v27 }
  0x30   :  { %881 = vmatpush3.bf16.msra.mxu0 %v949_v27 }
  0x31   :  { %882 = vmatprep.subr.bf16.mxu0 %v950_v28 }
  0x32   :  { %835 = vmatmul.mubr.bf16.gmra.mrb[8].mxu0 %v935_v19 }
  0x33   :  { %838 = vmatprep.mubr.bf16.mxu0 %v936_v20 }
  0x34   :  { %883 = vmatpush3.bf16.msra.mxu0 %v950_v28 }
  0x35   :  { %884 = vmatprep.subr.bf16.mxu0 %v951_v6 }
  0x38   :  { %885 = vmatpush3.bf16.msra.mxu0 %v951_v6 }
  0x39   :  { %886 = vmatprep.subr.bf16.mxu0 %v952_v7 }
  0x3a   :  { %839 = vmatmul.mubr.bf16.gmra.mrb[12].mxu0 %v937_v21 }
  0x3c   :  { %887 = vmatpush3.bf16.msra.mxu0 %v952_v7 }
  0x3d   :  { %888 = vmatprep.subr.bf16.mxu0 %v953_v8 }
  0x40   :  { %889 = vmatpush3.bf16.msra.mxu0 %v953_v8 }
  0xf5   :  { %v828_v29 = vpop.f32.mrb[0].mxu0 }
  0xf6   :  { %v196_v31 = vpop.f32.mrb[1].mxu0  ;;  %v205_v33 = vadd.f32 %v828_v29, %v727_v30 }
  0xf7   :  { %v829_v32 = vpop.f32.mrb[2].mxu0  ;;  %v197_v36 = vadd.f32 %v727_v30, %v196_v31 }
  0xf8   :  { %v208_v34 = vadd.f32 %v829_v32, %v727_v30  ;;  %v199_v35 = vpop.f32.mrb[3].mxu0 }
  0xf9   :  { %v200_v37 = vadd.f32 %v727_v30, %v199_v35 }
  0xfa   :  { %v260_v38 = vpack.c.bf16 %v208_v34, %v205_v33 }
  0xfb   :  { %v259_v39 = vpack.c.bf16 %v200_v37, %v197_v36 }
  0xfd   :  { %v832_v40 = vpop.f32.mrb[4].mxu0  ;;  %858 = vmatprep.mubr.bf16.mxu1 %v259_v39 }
  0xfe   :  { %v212_v41 = vpop.f32.mrb[5].mxu0  ;;  %859 = vmatmul.mubr.bf16.vlgmr.msra.gmra.mrb[0].mxu1 %v260_v38  ;;  %v221_v43 = vadd.f32 %v832_v40, %v727_v30 }
  0xff   :  { %v833_v42 = vpop.f32.mrb[6].mxu0  ;;  %914 = vmatpush3.bf16.msra.mxu1 %v946_v24  ;;  %v213_v46 = vadd.f32 %v727_v30, %v212_v41 }
 0x100   :  { %v224_v44 = vadd.f32 %v833_v42, %v727_v30  ;;  %v215_v45 = vpop.f32.mrb[7].mxu0  ;;  %907 = vmatprep.subr.bf16.mxu1 %v947_v25 }
 0x101   :  { %v216_v47 = vadd.f32 %v727_v30, %v215_v45 }
 0x102   :  { %v262_v48 = vpack.c.bf16 %v224_v44, %v221_v43 }
 0x103   :  { %v261_v49 = vpack.c.bf16 %v216_v47, %v213_v46  ;;  %915 = vmatpush3.bf16.msra.mxu1 %v947_v25 }
 0x104   :  { %908 = vmatprep.subr.bf16.mxu1 %v948_v26 }
 0x105   :  { %v836_v50 = vpop.f32.mrb[8].mxu0  ;;  %862 = vmatprep.mubr.bf16.mxu1 %v261_v49 }
 0x106   :  { %v228_v51 = vpop.f32.mrb[9].mxu0  ;;  %863 = vmatmul.mubr.bf16.gmra.mrb[4].mxu1 %v262_v48  ;;  %v237_v53 = vadd.f32 %v836_v50, %v727_v30 }
 0x107   :  { %v837_v52 = vpop.f32.mrb[10].mxu0  ;;  %916 = vmatpush3.bf16.msra.mxu1 %v948_v26  ;;  %v229_v56 = vadd.f32 %v727_v30, %v228_v51 }
 0x108   :  { %v240_v54 = vadd.f32 %v837_v52, %v727_v30  ;;  %v231_v55 = vpop.f32.mrb[11].mxu0  ;;  %909 = vmatprep.subr.bf16.mxu1 %v949_v27 }
 0x109   :  { %v232_v57 = vadd.f32 %v727_v30, %v231_v55 }
 0x10a   :  { %v264_v58 = vpack.c.bf16 %v240_v54, %v237_v53 }
 0x10b   :  { %v263_v59 = vpack.c.bf16 %v232_v57, %v229_v56  ;;  %917 = vmatpush3.bf16.msra.mxu1 %v949_v27 }
 0x10c   :  { %910 = vmatprep.subr.bf16.mxu1 %v950_v28 }
 0x10d   :  { %v840_v60 = vpop.f32.mrb[12].mxu0  ;;  %866 = vmatprep.mubr.bf16.mxu1 %v263_v59 }
 0x10e   :  { %v244_v61 = vpop.f32.mrb[13].mxu0  ;;  %867 = vmatmul.mubr.bf16.gmra.mrb[8].mxu1 %v264_v58  ;;  %v253_v63 = vadd.f32 %v840_v60, %v727_v30 }
 0x10f   :  { %v841_v62 = vpop.f32.mrb[14].mxu0  ;;  %918 = vmatpush3.bf16.msra.mxu1 %v950_v28  ;;  %v245_v2 = vadd.f32 %v727_v30, %v244_v61 }
 0x110   :  { %v256_v0 = vadd.f32 %v841_v62, %v727_v30  ;;  %v247_v1 = vpop.f32.mrb[15].mxu0  ;;  %911 = vmatprep.subr.bf16.mxu1 %v951_v6 }
 0x111   :  { %v248_v3 = vadd.f32 %v727_v30, %v247_v1 }
 0x112   :  { %v266_v4 = vpack.c.bf16 %v256_v0, %v253_v63 }
 0x113   :  { %v265_v5 = vpack.c.bf16 %v248_v3, %v245_v2  ;;  %919 = vmatpush3.bf16.msra.mxu1 %v951_v6 }
 0x114   :  { %912 = vmatprep.subr.bf16.mxu1 %v952_v7 }
 0x115   :  { %870 = vmatprep.mubr.bf16.mxu1 %v265_v5 }
 0x116   :  { %871 = vmatmul.mubr.bf16.gmra.mrb[12].mxu1 %v266_v4 }
 0x117   :  { %920 = vmatpush3.bf16.msra.mxu1 %v952_v7 }
 0x118   :  { %913 = vmatprep.subr.bf16.mxu1 %v953_v8 }
 0x11b   :  { %921 = vmatpush3.bf16.msra.mxu1 %v953_v8 }
 0x1d1   :  { %v860_v10 = vpop.f32.mrb[0].mxu1 }
 0x1d2   :  { %v381_v11 = vadd.f32 %v860_v10, %v1096_v9  ;;  %v372_v12 = vpop.f32.mrb[1].mxu1 }
 0x1d3   :  { %v373_v13 = vadd.f32 %v1096_v9, %v372_v12  ;;  %v861_v14 = vpop.f32.mrb[2].mxu1 }
 0x1d4   :  { %v453_v15 = vmul.f32 0.3, %v381_v11  ;;  %v384_v16 = vadd.f32 %v861_v14, %v1096_v9  ;;  %v375_v17 = vpop.f32.mrb[3].mxu1  ;;  %vm437_vm0 = vcmp.gt.f32.partialorder %v381_v11, 0.0 }
 0x1d5   :  { %v451_v18 = vmul.f32 0.3, %v373_v13  ;;  %v376_v19 = vadd.f32 %v1096_v9, %v375_v17  ;;  %vm435_vm1 = vcmp.gt.f32.partialorder %v373_v13, 0.0 }
 0x1d6   :  { %vm438_vm2 = vcmp.gt.f32.partialorder %v384_v16, 0.0  ;;  %v454_v20 = vmul.f32 0.3, %v384_v16  ;;  %v469_v22 = vsel %vm437_vm0, %v381_v11, %v453_v15 }
 0x1d7   :  { %vm436_vm3 = vcmp.gt.f32.partialorder %v376_v19, 0.0  ;;  %v452_v21 = vmul.f32 0.3, %v376_v19  ;;  %v467_v26 = vsel %vm435_vm1, %v373_v13, %v451_v18 }
 0x1d8   :  { %v470_v23 = vsel %vm438_vm2, %v384_v16, %v454_v20 }
 0x1d9   :  { %v484_v24 = vpack.c.bf16 %v470_v23, %v469_v22  ;;  %v864_v25 = vpop.f32.mrb[4].mxu1  ;;  %v468_v27 = vsel %vm436_vm3, %v376_v19, %v452_v21  ;;  %v1117_v19 = vld [vmem:[%s1189_s6] ss:$0 sm:$0xff] }
 0x1da   :  { %v397_v28 = vadd.f32 %v864_v25, %v1096_v9  ;;  %v388_v29 = vpop.f32.mrb[5].mxu1  ;;  %v483_v30 = vpack.c.bf16 %v468_v27, %v467_v26 }
 0x1db   :  { %v389_v31 = vadd.f32 %v1096_v9, %v388_v29  ;;  %v865_v32 = vpop.f32.mrb[6].mxu1 }
 0x1dc   :  { %v457_v33 = vmul.f32 0.3, %v397_v28  ;;  %v400_v34 = vadd.f32 %v865_v32, %v1096_v9  ;;  %v391_v35 = vpop.f32.mrb[7].mxu1  ;;  %890 = vmatprep.mubr.bf16.mxu0 %v483_v30  ;;  %vm441_vm4 = vcmp.gt.f32.partialorder %v397_v28, 0.0 }
 0x1dd   :  { %v455_v36 = vmul.f32 0.3, %v389_v31  ;;  %v392_v37 = vadd.f32 %v1096_v9, %v391_v35  ;;  %891 = vmatmul.mubr.bf16.vlgmr.msra.gmra.mrb[16].mxu0 %v484_v24  ;;  %vm439_vm5 = vcmp.gt.f32.partialorder %v389_v31, 0.0 }
 0x1de   :  { %vm442_vm6 = vcmp.gt.f32.partialorder %v400_v34, 0.0  ;;  %v458_v38 = vmul.f32 0.3, %v400_v34  ;;  %v473_v40 = vsel %vm441_vm4, %v397_v28, %v457_v33 }
 0x1df   :  { %vm440_vm7 = vcmp.gt.f32.partialorder %v392_v37, 0.0  ;;  %v456_v39 = vmul.f32 0.3, %v392_v37  ;;  %v471_v43 = vsel %vm439_vm5, %v389_v31, %v455_v36 }
 0x1e0   :  { %v474_v41 = vsel %vm442_vm6, %v400_v34, %v458_v38 }
 0x1e1   :  { %v868_v42 = vpop.f32.mrb[8].mxu1  ;;  %v472_v44 = vsel %vm440_vm7, %v392_v37, %v456_v39  ;;  %v486_v45 = vpack.c.bf16 %v474_v41, %v473_v40 }
 0x1e2   :  { %v413_v46 = vadd.f32 %v868_v42, %v1096_v9  ;;  %v404_v47 = vpop.f32.mrb[9].mxu1  ;;  %v485_v48 = vpack.c.bf16 %v472_v44, %v471_v43 }
 0x1e3   :  { %v405_v49 = vadd.f32 %v1096_v9, %v404_v47  ;;  %v869_v50 = vpop.f32.mrb[10].mxu1 }
 0x1e4   :  { %v461_v51 = vmul.f32 0.3, %v413_v46  ;;  %v416_v52 = vadd.f32 %v869_v50, %v1096_v9  ;;  %v407_v53 = vpop.f32.mrb[11].mxu1  ;;  %894 = vmatprep.mubr.bf16.mxu0 %v485_v48  ;;  %vm445_vm8 = vcmp.gt.f32.partialorder %v413_v46, 0.0 }
 0x1e5   :  { %v459_v54 = vmul.f32 0.3, %v405_v49  ;;  %v408_v55 = vadd.f32 %v1096_v9, %v407_v53  ;;  %895 = vmatmul.mubr.bf16.gmra.mrb[20].mxu0 %v486_v45  ;;  %vm443_vm9 = vcmp.gt.f32.partialorder %v405_v49, 0.0 }
 0x1e6   :  { %vm446_vm10 = vcmp.gt.f32.partialorder %v416_v52, 0.0  ;;  %v462_v56 = vmul.f32 0.3, %v416_v52  ;;  %v477_v58 = vsel %vm445_vm8, %v413_v46, %v461_v51 }
 0x1e7   :  { %vm444_vm11 = vcmp.gt.f32.partialorder %v408_v55, 0.0  ;;  %v460_v57 = vmul.f32 0.3, %v408_v55  ;;  %v475_v62 = vsel %vm443_vm9, %v405_v49, %v459_v54 }
 0x1e8   :  { %v478_v59 = vsel %vm446_vm10, %v416_v52, %v462_v56 }
 0x1e9   :  { %v488_v60 = vpack.c.bf16 %v478_v59, %v477_v58  ;;  %v872_v61 = vpop.f32.mrb[12].mxu1  ;;  %v476_v63 = vsel %vm444_vm11, %v408_v55, %v460_v57 }
 0x1ea   :  { %v429_v0 = vadd.f32 %v872_v61, %v1096_v9  ;;  %v420_v1 = vpop.f32.mrb[13].mxu1  ;;  %v487_v2 = vpack.c.bf16 %v476_v63, %v475_v62 }
 0x1eb   :  { %v421_v3 = vadd.f32 %v1096_v9, %v420_v1  ;;  %v873_v4 = vpop.f32.mrb[14].mxu1 }
 0x1ec   :  { %v465_v5 = vmul.f32 0.3, %v429_v0  ;;  %v432_v6 = vadd.f32 %v873_v4, %v1096_v9  ;;  %v423_v7 = vpop.f32.mrb[15].mxu1  ;;  %898 = vmatprep.mubr.bf16.mxu1 %v487_v2  ;;  %vm449_vm12 = vcmp.gt.f32.partialorder %v429_v0, 0.0 }
 0x1ed   :  { %v463_v8 = vmul.f32 0.3, %v421_v3  ;;  %v424_v10 = vadd.f32 %v1096_v9, %v423_v7  ;;  %899 = vmatmul.mubr.bf16.vlgmr.msra.gmra.mrb[16].mxu1 %v488_v60  ;;  %vm447_vm13 = vcmp.gt.f32.partialorder %v421_v3, 0.0 }
 0x1ee   :  { %vm450_vm14 = vcmp.gt.f32.partialorder %v432_v6, 0.0  ;;  %v466_v11 = vmul.f32 0.3, %v432_v6  ;;  %v481_v13 = vsel %vm449_vm12, %v429_v0, %v465_v5 }
 0x1ef   :  { %vm448_vm15 = vcmp.gt.f32.partialorder %v424_v10, 0.0  ;;  %v464_v12 = vmul.f32 0.3, %v424_v10  ;;  %v479_v15 = vsel %vm447_vm13, %v421_v3, %v463_v8 }
 0x1f0   :  { %v482_v14 = vsel %vm450_vm14, %v432_v6, %v466_v11 }
 0x1f1   :  { %v480_v16 = vsel %vm448_vm15, %v424_v10, %v464_v12  ;;  %v490_v17 = vpack.c.bf16 %v482_v14, %v481_v13 }
 0x1f2   :  { %v489_v18 = vpack.c.bf16 %v480_v16, %v479_v15 }
 0x1f4   :  { %902 = vmatprep.mubr.bf16.mxu1 %v489_v18 }
 0x1f5   :  { %903 = vmatmul.mubr.bf16.gmra.mrb[20].mxu1 %v490_v17 }
 0x2b0   :  { %v892_v9 = vpop.f32.mrb[16].mxu0 }
 0x2b1   :  { %v605_v20 = vadd.f32 %v892_v9, %v1117_v19  ;;  %v596_v21 = vpop.f32.mrb[17].mxu0 }
 0x2b2   :  { %v597_v22 = vadd.f32 %v1117_v19, %v596_v21  ;;  %v893_v23 = vpop.f32.mrb[18].mxu0 }
 0x2b3   :  { %vm661_vm0 = vcmp.gt.f32.partialorder %v605_v20, 0.0  ;;  %v677_v24 = vmul.f32 0.3, %v605_v20  ;;  %v608_v25 = vadd.f32 %v893_v23, %v1117_v19  ;;  %v599_v26 = vpop.f32.mrb[19].mxu0 }
 0x2b4   :  { %vm659_vm1 = vcmp.gt.f32.partialorder %v597_v22, 0.0  ;;  %v675_v27 = vmul.f32 0.3, %v597_v22  ;;  %v600_v28 = vadd.f32 %v1117_v19, %v599_v26 }
 0x2b5   :  { %v693_v29 = vsel %vm661_vm0, %v605_v20, %v677_v24  ;;  %vm662_vm2 = vcmp.gt.f32.partialorder %v608_v25, 0.0  ;;  %v678_v30 = vmul.f32 0.3, %v608_v25 }
 0x2b6   :  { %709 = vst [vmem:[%s1190_s7 + $0x10] sm:$0xff] %v693_v29  ;;  %v691_v31 = vsel %vm659_vm1, %v597_v22, %v675_v27  ;;  %vm660_vm3 = vcmp.gt.f32.partialorder %v600_v28, 0.0  ;;  %v676_v32 = vmul.f32 0.3, %v600_v28 }
 0x2b7   :  { %707 = vst [vmem:[%s1190_s7] sm:$0xff] %v691_v31  ;;  %v694_v33 = vsel %vm662_vm2, %v608_v25, %v678_v30 }
 0x2b8   :  { %710 = vst [vmem:[%s1190_s7 + $0x18] sm:$0xff] %v694_v33  ;;  %v692_v34 = vsel %vm660_vm3, %v600_v28, %v676_v32  ;;  %v896_v35 = vpop.f32.mrb[20].mxu0 }
 0x2b9   :  { %708 = vst [vmem:[%s1190_s7 + $0x8] sm:$0xff] %v692_v34  ;;  %v621_v36 = vadd.f32 %v896_v35, %v1117_v19  ;;  %v612_v37 = vpop.f32.mrb[21].mxu0 }
 0x2ba   :  { %v613_v38 = vadd.f32 %v1117_v19, %v612_v37  ;;  %v897_v39 = vpop.f32.mrb[22].mxu0 }
 0x2bb   :  { %vm665_vm4 = vcmp.gt.f32.partialorder %v621_v36, 0.0  ;;  %v681_v40 = vmul.f32 0.3, %v621_v36  ;;  %v624_v41 = vadd.f32 %v897_v39, %v1117_v19  ;;  %v615_v42 = vpop.f32.mrb[23].mxu0 }
 0x2bc   :  { %vm663_vm5 = vcmp.gt.f32.partialorder %v613_v38, 0.0  ;;  %v679_v43 = vmul.f32 0.3, %v613_v38  ;;  %v616_v44 = vadd.f32 %v1117_v19, %v615_v42 }
 0x2bd   :  { %v697_v45 = vsel %vm665_vm4, %v621_v36, %v681_v40  ;;  %vm666_vm6 = vcmp.gt.f32.partialorder %v624_v41, 0.0  ;;  %v682_v46 = vmul.f32 0.3, %v624_v41 }
 0x2be   :  { %713 = vst [vmem:[%s1190_s7 + $0x30] sm:$0xff] %v697_v45  ;;  %v695_v47 = vsel %vm663_vm5, %v613_v38, %v679_v43  ;;  %vm664_vm7 = vcmp.gt.f32.partialorder %v616_v44, 0.0  ;;  %v680_v48 = vmul.f32 0.3, %v616_v44 }
 0x2bf   :  { %711 = vst [vmem:[%s1190_s7 + $0x20] sm:$0xff] %v695_v47  ;;  %v698_v49 = vsel %vm666_vm6, %v624_v41, %v682_v46 }
 0x2c0   :  { %714 = vst [vmem:[%s1190_s7 + $0x38] sm:$0xff] %v698_v49  ;;  %v696_v50 = vsel %vm664_vm7, %v616_v44, %v680_v48  ;;  %v900_v51 = vpop.f32.mrb[16].mxu1 }
 0x2c1   :  { %712 = vst [vmem:[%s1190_s7 + $0x28] sm:$0xff] %v696_v50  ;;  %v637_v52 = vadd.f32 %v900_v51, %v1117_v19  ;;  %v628_v53 = vpop.f32.mrb[17].mxu1 }
 0x2c2   :  { %v629_v54 = vadd.f32 %v1117_v19, %v628_v53  ;;  %v901_v55 = vpop.f32.mrb[18].mxu1 }
 0x2c3   :  { %vm669_vm8 = vcmp.gt.f32.partialorder %v637_v52, 0.0  ;;  %v685_v56 = vmul.f32 0.3, %v637_v52  ;;  %v640_v57 = vadd.f32 %v901_v55, %v1117_v19  ;;  %v631_v58 = vpop.f32.mrb[19].mxu1 }
 0x2c4   :  { %vm667_vm9 = vcmp.gt.f32.partialorder %v629_v54, 0.0  ;;  %v683_v59 = vmul.f32 0.3, %v629_v54  ;;  %v632_v60 = vadd.f32 %v1117_v19, %v631_v58 }
 0x2c5   :  { %v701_v61 = vsel %vm669_vm8, %v637_v52, %v685_v56  ;;  %vm670_vm10 = vcmp.gt.f32.partialorder %v640_v57, 0.0  ;;  %v686_v62 = vmul.f32 0.3, %v640_v57 }
 0x2c6   :  { %717 = vst [vmem:[%s1190_s7 + $0x50] sm:$0xff] %v701_v61  ;;  %v699_v63 = vsel %vm667_vm9, %v629_v54, %v683_v59  ;;  %vm668_vm11 = vcmp.gt.f32.partialorder %v632_v60, 0.0  ;;  %v684_v0 = vmul.f32 0.3, %v632_v60 }
 0x2c7   :  { %715 = vst [vmem:[%s1190_s7 + $0x40] sm:$0xff] %v699_v63  ;;  %v702_v1 = vsel %vm670_vm10, %v640_v57, %v686_v62 }
 0x2c8   :  { %718 = vst [vmem:[%s1190_s7 + $0x58] sm:$0xff] %v702_v1  ;;  %v700_v2 = vsel %vm668_vm11, %v632_v60, %v684_v0  ;;  %v904_v3 = vpop.f32.mrb[20].mxu1 }
 0x2c9   :  { %716 = vst [vmem:[%s1190_s7 + $0x48] sm:$0xff] %v700_v2  ;;  %v653_v4 = vadd.f32 %v904_v3, %v1117_v19  ;;  %v644_v5 = vpop.f32.mrb[21].mxu1 }
 0x2ca   :  { %v645_v6 = vadd.f32 %v1117_v19, %v644_v5  ;;  %v905_v7 = vpop.f32.mrb[22].mxu1 }
 0x2cb   :  { %vm673_vm12 = vcmp.gt.f32.partialorder %v653_v4, 0.0  ;;  %v689_v8 = vmul.f32 0.3, %v653_v4  ;;  %v656_v10 = vadd.f32 %v905_v7, %v1117_v19  ;;  %v647_v11 = vpop.f32.mrb[23].mxu1 }
 0x2cc   :  { %vm671_vm13 = vcmp.gt.f32.partialorder %v645_v6, 0.0  ;;  %v687_v12 = vmul.f32 0.3, %v645_v6  ;;  %v648_v13 = vadd.f32 %v1117_v19, %v647_v11 }
 0x2cd   :  { %v705_v14 = vsel %vm673_vm12, %v653_v4, %v689_v8  ;;  %vm674_vm14 = vcmp.gt.f32.partialorder %v656_v10, 0.0  ;;  %v690_v15 = vmul.f32 0.3, %v656_v10 }
 0x2ce   :  { %721 = vst [vmem:[%s1190_s7 + $0x70] sm:$0xff] %v705_v14  ;;  %v703_v16 = vsel %vm671_vm13, %v645_v6, %v687_v12  ;;  %vm672_vm15 = vcmp.gt.f32.partialorder %v648_v13, 0.0  ;;  %v688_v17 = vmul.f32 0.3, %v648_v13 }
 0x2cf   :  { %719 = vst [vmem:[%s1190_s7 + $0x60] sm:$0xff] %v703_v16  ;;  %v706_v18 = vsel %vm674_vm14, %v656_v10, %v690_v15 }
 0x2d0   :  { %722 = vst [vmem:[%s1190_s7 + $0x78] sm:$0xff] %v706_v18  ;;  %v704_v19 = vsel %vm672_vm15, %v648_v13, %v688_v17 }
 0x2d1   :  { %720 = vst [vmem:[%s1190_s7 + $0x68] sm:$0xff] %v704_v19 }

</bundles_post_ra>
